<compile_context>
chip_gen: v5e
topology: v5e:2x2
jax: 0.10.0
libtpu: 0.0.40
codegen_flags: <defaults>
</compile_context>

<pallas_src>
import jax
import jax.numpy as jnp
from jax.experimental import pallas as pl
from jax.experimental.pallas import tpu as pltpu


# ----------------------------------------------------------------------------
# Pallas kernels
# ----------------------------------------------------------------------------
def _timegraph_matmul_kernel(m_ref, x_ref, o_ref):
    """x: (Gt, W*F) rows (one row per (batch, channel) slice);
       m: (W*F, W*F) = (A^k)^T kron I_F.  One lane-dense GEMM per grid step."""
    o_ref[...] = jnp.dot(
        x_ref[...], m_ref[...], preferred_element_type=jnp.float32
    ).astype(o_ref.dtype)


def _timegraph_bmm_kernel(a_ref, x_ref, o_ref):
    """Fallback for large W*F: x/o: (Gt, W, F); a: (W, W) = A^k.
       One small (W,W)@(W,F) matmul per (batch, channel) row; F stays on
       lanes, no in-kernel transposes."""
    a = a_ref[...]
    for g in range(x_ref.shape[0]):          # static trip count -> fully unrolled
        o_ref[g] = jnp.dot(
            a, x_ref[g], preferred_element_type=jnp.float32
        ).astype(o_ref.dtype)


# ----------------------------------------------------------------------------
# Tiling helper
# ----------------------------------------------------------------------------
def _choose_row_tile(rows, lane_width, itemsize=4, target_block_bytes=2 << 20):
    """Rows per grid step: big enough to amortize per-step overhead and get
    efficient DMA bursts, small enough that double-buffered in+out blocks stay
    well under the default scoped VMEM on every TPU generation (incl. v7x)."""
    gt = max(8, (target_block_bytes // max(1, lane_width * itemsize)) // 8 * 8)
    gt = min(gt, rows)
    # Prefer >=2 grid steps when the problem allows it (megacore sharding).
    if rows >= 16 and rows <= gt:
        half = (((rows + 1) // 2) + 7) // 8 * 8
        gt = min(rows, max(8, half))
    return gt


# ----------------------------------------------------------------------------
# Propagation wrapper:  y[b, c, :, :] = A^k @ x[b, c, :, :]   (no HBM transposes)
# ----------------------------------------------------------------------------
def timegraph_propagate(a_k, x, *, use_kron=None):
    """a_k: (W, W) f32 propagation matrix (already raised to the k-th power).
       x:   (B, C, W, F) f32 in its native layout.
       Returns (B, C, W, F) f32."""
    B, C, W, F = x.shape
    rows = B * C
    wf = W * F
    if use_kron is None:
        # Kronecker operand is (wf, wf) f32; keep it small (<=1 MiB resident)
        # so the kernel stays memory-bound and VMEM-safe on all generations.
        use_kron = wf <= 512

    if use_kron:
        # Single lane-dense GEMM path.
        x2 = x.reshape(rows, wf)                                  # free reshape
        m = jnp.kron(a_k.T, jnp.eye(F, dtype=a_k.dtype))          # (wf, wf)
        gt = _choose_row_tile(rows, wf)
        grid = (pl.cdiv(rows, gt),)
        y2 = pl.pallas_call(
            _timegraph_matmul_kernel,
            out_shape=jax.ShapeDtypeStruct((rows, wf), x.dtype),
            grid_spec=pltpu.PrefetchScalarGridSpec(
                num_scalar_prefetch=0,
                grid=grid,
                in_specs=[
                    pl.BlockSpec((wf, wf), lambda i: (0, 0)),     # M: resident
                    pl.BlockSpec((gt, wf), lambda i: (i, 0)),     # x rows
                ],
                out_specs=pl.BlockSpec((gt, wf), lambda i: (i, 0)),
            ),
            compiler_params=pltpu.CompilerParams(
                dimension_semantics=("parallel",),
            ),
        )(m, x2)
        return y2.reshape(B, C, W, F)

    # Fallback: per-(b, c) matmuls, F lane-dense, A^k kept at (W, W).
    x3 = x.reshape(rows, W, F)                                    # free reshape
    gt = rows if rows <= 16 else 16          # inner loop is unrolled; keep modest
    grid = (pl.cdiv(rows, gt),)
    y3 = pl.pallas_call(
        _timegraph_bmm_kernel,
        out_shape=jax.ShapeDtypeStruct((rows, W, F), x.dtype),
        grid_spec=pltpu.PrefetchScalarGridSpec(
            num_scalar_prefetch=0,
            grid=grid,
            in_specs=[
                pl.BlockSpec((W, W), lambda i: (0, 0)),           # A^k: resident
                pl.BlockSpec((gt, W, F), lambda i: (i, 0, 0)),    # x rows
            ],
            out_specs=pl.BlockSpec((gt, W, F), lambda i: (i, 0, 0)),
        ),
        compiler_params=pltpu.CompilerParams(
            dimension_semantics=("parallel",),
        ),
    )(a_k, x3)
    return y3.reshape(B, C, W, F)


# ----------------------------------------------------------------------------
# Module-equivalent wrapper
# ----------------------------------------------------------------------------
def _normalize_sym(adj):
    # Symmetric GCN normalization D^{-1/2} A D^{-1/2}.
    # TODO(synk): confirm the exact `normalize` helper used in models/STGENet.py
    # (it is not defined in the provided module source).
    d = jnp.sum(adj, axis=1)
    d_inv_sqrt = jnp.where(d > 0, jax.lax.rsqrt(d), 0.0)
    return adj * d_inv_sqrt[:, None] * d_inv_sqrt[None, :]


class TimeGraph:
    """JAX/Pallas re-implementation of the PyTorch TimeGraph forward pass."""

    def __init__(self, window, k, channels, time_GCN=True):
        self.window = window
        self.k = k
        self.channels = channels
        self.time_GCN = time_GCN
        # nn.Parameter(0.5 * ones(W,W) + 1.5 * eye(W)) -- deterministic init.
        self.adj = (0.5 * jnp.ones((window, window), jnp.float32)
                    + 1.5 * jnp.eye(window, dtype=jnp.float32))

    def __call__(self, x):
        # x: (B, C, W, F)
        B, C, W, F = x.shape
        assert W == self.window and C == self.channels

        if not self.time_GCN:
            # A = I -> k-step propagation is the identity; skip the kernel.
            return x, jnp.eye(self.window, dtype=jnp.float32)

        adj = (self.adj + self.adj.T) / 2.0
        A = _normalize_sym(adj)
        adj_out = jax.nn.relu(adj)

        if self.k <= 0:
            return x, adj_out

        # A^k precomputed in plain JAX: (k-1) tiny (W, W) matmuls.
        a_k = A
        for _ in range(self.k - 1):
            a_k = A @ a_k

        y = timegraph_propagate(a_k.astype(jnp.float32), x.astype(jnp.float32))
        return y.astype(x.dtype), adj_out


# ----------------------------------------------------------------------------
# Demo / self-check
# ----------------------------------------------------------------------------
if __name__ == "__main__":
    B, C, W, F = 2, 4, 16, 16   # batch, channels, window, features  (W*F = 256)
    k = 3

    key = jax.random.PRNGKey(0)
    x = jax.random.normal(key, (B, C, W, F), dtype=jnp.float32)

    module = TimeGraph(window=W, k=k, channels=C, time_GCN=True)
    y, adj = module(x)
    y = jax.block_until_ready(y)
    adj = jax.block_until_ready(adj)

    # Pure-JAX reference replicating the PyTorch forward.
    adj_sym = (module.adj + module.adj.T) / 2.0
    A_ref = _normalize_sym(adj_sym)
    xr = jnp.transpose(x, (0, 2, 1, 3)).reshape(B, W, C * F)
    for _ in range(k):
        xr = jnp.einsum("wv,bvd->bwd", A_ref, xr)
    y_ref = jnp.transpose(xr.reshape(B, W, C, F), (0, 2, 1, 3))
    adj_ref = jax.nn.relu(adj_sym)

    # Also exercise the non-Kronecker fallback kernel at the same shapes.
    a_k = A_ref
    for _ in range(k - 1):
        a_k = A_ref @ a_k
    y_fb = jax.block_until_ready(timegraph_propagate(a_k, x, use_kron=False))

    assert y.shape == (B, C, W, F)
    assert adj.shape == (W, W)
    assert jnp.allclose(adj, adj_ref, atol=1e-6, rtol=1e-6)
    assert jnp.allclose(y, y_ref, atol=1e-4, rtol=1e-4)
    assert jnp.allclose(y_fb, y_ref, atol=1e-4, rtol=1e-4)

    print("KERNEL_OK")
</pallas_src>

<mosaic_0001>
module attributes {stable_mosaic.version = 11 : i64} {
  func.func @_timegraph_matmul_kernel(%arg0: i32, %arg1: memref<256x256xf32, #tpu.memory_space<vmem>>, %arg2: memref<8x256xf32, #tpu.memory_space<vmem>>, %arg3: memref<8x256xf32, #tpu.memory_space<vmem>>) attributes {dimension_semantics = [#tpu.dimension_semantics<parallel>], iteration_bounds = array<i64: 1>, scalar_prefetch = 0 : i64, scratch_operands = 0 : i64, tpu.core_type = #tpu.core_type<tc>, window_params = [{pipeline_mode = #tpu.pipeline_mode<synchronous>, transform_indices = @transform_0, window_bounds = array<i64: 256, 256>}, {transform_indices = @transform_1, window_bounds = array<i64: 8, 256>}, {transform_indices = @transform_2, window_bounds = array<i64: 8, 256>}]} {
    %c0 = arith.constant 0 : index
    %c0_0 = arith.constant 0 : index
    %0 = vector.load %arg2[%c0, %c0_0] : memref<8x256xf32, #tpu.memory_space<vmem>>, vector<8x256xf32>
    %c0_1 = arith.constant 0 : index
    %c0_2 = arith.constant 0 : index
    %1 = vector.load %arg1[%c0_1, %c0_2] : memref<256x256xf32, #tpu.memory_space<vmem>>, vector<256x256xf32>
    %cst = arith.constant dense<0.000000e+00> : vector<8x256xf32>
    %2 = tpu.matmul %0, %1, %cst {dimension_numbers = #tpu.dot_dimension_numbers<[1], [0], [0], [1], [0, 0, 1, 1], [], []>} : vector<8x256xf32>, vector<256x256xf32>, vector<8x256xf32> -> vector<8x256xf32>
    %c0_3 = arith.constant 0 : index
    %c0_4 = arith.constant 0 : index
    %3 = vector.load %arg3[%c0_3, %c0_4] : memref<8x256xf32, #tpu.memory_space<vmem>>, vector<8x256xf32>
    tpu.vector_store %arg3[%c0_3, %c0_4], %2 {strides = array<i32>} : memref<8x256xf32, #tpu.memory_space<vmem>>, vector<8x256xf32>,
    return
  }
  func.func @transform_0(%arg0: i32) -> (i32, i32) {
    %c0_i32 = arith.constant 0 : i32
    %c0_i32_0 = arith.constant 0 : i32
    %c0_i32_1 = arith.constant 0 : i32
    return %c0_i32, %c0_i32_0 : i32, i32
  }
  func.func @transform_1(%arg0: i32) -> (i32, i32) {
    %c0_i32 = arith.constant 0 : i32
    %c0_i32_0 = arith.constant 0 : i32
    return %arg0, %c0_i32 : i32, i32
  }
  func.func @transform_2(%arg0: i32) -> (i32, i32) {
    %c0_i32 = arith.constant 0 : i32
    %c0_i32_0 = arith.constant 0 : i32
    return %arg0, %c0_i32 : i32, i32
  }
}

</mosaic_0001>

<bundles_post_ra>
// kernel: tpu_custom_call.1
= control target key start
LH: loop header
LB: loop body
LE: loop exit
PB: predicated region body
PF: predicated region fallthrough
CT: control target
= control target key end

     0   :  { %7 = vsyncpa [#allocation3], 0  ;;  %s320_s0 = inlined_call_operand.hbm [shape: f32[256,256], index: 0, kind: input, shape index: {}]   ;;  %s321_s1 = inlined_call_operand.hbm [shape: f32[8,256], index: 1, kind: input, shape index: {}]   ;;  %s322_s2 = inlined_call_operand.hbm [shape: f32[8,256], index: 2, kind: output, shape index: {}]  }
   0x1   :  { %8 = vsyncpa [#allocation6], 0 }
   0x2   :  { %9 = vsyncpa [#allocation4], 0  ;;  %s14_s11 = sshll.u32 %s320_s0, 4  ;;  %s291_s12 = smov [#allocation2]   ;;  %s15_s11 = int_to_ptr.hbm [resolvable:$true] %s14_s11 }
   0x3   :  { %s16_s13 = sshll.u32 %s291_s12, 4  ;;  %s28_s16 = sshll.u32 %s321_s1, 4  ;;  %s17_s13 = int_to_ptr.vmem [resolvable:$true] %s16_s13  ;;  %s29_s16 = int_to_ptr.hbm [resolvable:$true] %s28_s16 }
   0x4   :  { %s292_s17 = smov 256   ;;  %s293_s18 = smov 16  }
   0x5   :  { %22 = dma.hbm_to_vmem [thread:$0]  %s15_s11, 8192, %s17_s13, [#allocation3], %s292_s17, %s292_s17, %s293_s18  }
   0x6   :  { %s294_s19 = smov [#allocation5]  }
   0x7   :  { %s30_s20 = sshll.u32 %s294_s19, 4  ;;  %s31_s20 = int_to_ptr.vmem [resolvable:$true] %s30_s20 }
   0x8   :  { %33 = dma.hbm_to_vmem [thread:$0]  %s29_s16, 256, %s31_s20, [#allocation6]  }
   0x9   :  { %285 = dma.done.wait [#allocation3], 8192  }
   0xa   :  { %286 = vsyncadd [#allocation3], 4294959104 }
   0xb   :  { %287 = dma.done.wait [#allocation6], 256  }
   0xc   :  { %288 = vsyncadd [#allocation6], 4294967040  ;;  %v75_v0 = vld [vmem:[#allocation2 + $0xf8] sm:$0xff]  ;;  %v73_v2 = vld [vmem:[#allocation2 + $0xe8] sm:$0xff]  ;;  %s295_s0 = smov [#allocation7]   ;;  %s197_s23 = sshll.u32 %s322_s2, 4  ;;  %s198_s23 = int_to_ptr.hbm [resolvable:$true] %s197_s23 }
   0xd   :  { %v107_v1 = vld [vmem:[#allocation2 + $0x1f8] sm:$0xff]  ;;  %148 = vmatpush.msra.mxu2 %v75_v0  ;;  %v105_v3 = vld [vmem:[#allocation2 + $0x1e8] sm:$0xff]  ;;  %v74_v6 = vld [vmem:[#allocation2 + $0xf0] sm:$0xff]  ;;  %s195_s1 = sshll.u32 %s295_s0, 4  ;;  %s196_s1 = int_to_ptr.vmem [resolvable:$true] %s195_s1 }
   0xe   :  { %168 = vmatpush.msra.mxu3 %v107_v1  ;;  %v71_v4 = vld [vmem:[#allocation2 + $0xd8] sm:$0xff]  ;;  %v106_v7 = vld [vmem:[#allocation2 + $0x1f0] sm:$0xff]  ;;  %v72_v8 = vld [vmem:[#allocation2 + $0xe0] sm:$0xff]  ;;  %108 = vmatpush.msra.mxu0 %v74_v6 }
   0xf   :  { %v103_v5 = vld [vmem:[#allocation2 + $0x1d8] sm:$0xff]  ;;  %149 = vmatpush.msra.mxu2 %v73_v2  ;;  %v104_v9 = vld [vmem:[#allocation2 + $0x1e0] sm:$0xff]  ;;  %128 = vmatpush.msra.mxu1 %v106_v7  ;;  %v69_v10 = vld [vmem:[#allocation2 + $0xc8] sm:$0xff] }
  0x10   :  { %169 = vmatpush.msra.mxu3 %v105_v3  ;;  %v101_v11 = vld [vmem:[#allocation2 + $0x1c8] sm:$0xff]  ;;  %v70_v12 = vld [vmem:[#allocation2 + $0xd0] sm:$0xff]  ;;  %109 = vmatpush.msra.mxu0 %v72_v8  ;;  %v67_v14 = vld [vmem:[#allocation2 + $0xb8] sm:$0xff] }
  0x11   :  { %150 = vmatpush.msra.mxu2 %v71_v4  ;;  %v102_v13 = vld [vmem:[#allocation2 + $0x1d0] sm:$0xff]  ;;  %129 = vmatpush.msra.mxu1 %v104_v9  ;;  %v99_v15 = vld [vmem:[#allocation2 + $0x1b8] sm:$0xff]  ;;  %v68_v16 = vld [vmem:[#allocation2 + $0xc0] sm:$0xff] }
  0x12   :  { %170 = vmatpush.msra.mxu3 %v103_v5  ;;  %v100_v17 = vld [vmem:[#allocation2 + $0x1c0] sm:$0xff]  ;;  %110 = vmatpush.msra.mxu0 %v70_v12  ;;  %v65_v18 = vld [vmem:[#allocation2 + $0xa8] sm:$0xff]  ;;  %v66_v20 = vld [vmem:[#allocation2 + $0xb0] sm:$0xff] }
  0x13   :  { %151 = vmatpush.msra.mxu2 %v69_v10  ;;  %130 = vmatpush.msra.mxu1 %v102_v13  ;;  %v97_v19 = vld [vmem:[#allocation2 + $0x1a8] sm:$0xff]  ;;  %v98_v21 = vld [vmem:[#allocation2 + $0x1b0] sm:$0xff]  ;;  %v63_v22 = vld [vmem:[#allocation2 + $0x98] sm:$0xff] }
  0x14   :  { %171 = vmatpush.msra.mxu3 %v101_v11  ;;  %111 = vmatpush.msra.mxu0 %v68_v16  ;;  %v95_v23 = vld [vmem:[#allocation2 + $0x198] sm:$0xff]  ;;  %v64_v24 = vld [vmem:[#allocation2 + $0xa0] sm:$0xff]  ;;  %v61_v26 = vld [vmem:[#allocation2 + $0x88] sm:$0xff] }
  0x15   :  { %152 = vmatpush.msra.mxu2 %v67_v14  ;;  %131 = vmatpush.msra.mxu1 %v100_v17  ;;  %v96_v25 = vld [vmem:[#allocation2 + $0x1a0] sm:$0xff]  ;;  %v93_v27 = vld [vmem:[#allocation2 + $0x188] sm:$0xff]  ;;  %v62_v28 = vld [vmem:[#allocation2 + $0x90] sm:$0xff] }
  0x16   :  { %172 = vmatpush.msra.mxu3 %v99_v15  ;;  %112 = vmatpush.msra.mxu0 %v66_v20  ;;  %v94_v29 = vld [vmem:[#allocation2 + $0x190] sm:$0xff]  ;;  %v59_v30 = vld [vmem:[#allocation2 + $0x78] sm:$0xff]  ;;  %v60_v32 = vld [vmem:[#allocation2 + $0x80] sm:$0xff] }
  0x17   :  { %153 = vmatpush.msra.mxu2 %v65_v18  ;;  %132 = vmatpush.msra.mxu1 %v98_v21  ;;  %v91_v31 = vld [vmem:[#allocation2 + $0x178] sm:$0xff]  ;;  %v92_v33 = vld [vmem:[#allocation2 + $0x180] sm:$0xff]  ;;  %v57_v34 = vld [vmem:[#allocation2 + $0x68] sm:$0xff] }
  0x18   :  { %173 = vmatpush.msra.mxu3 %v97_v19  ;;  %113 = vmatpush.msra.mxu0 %v64_v24  ;;  %v89_v35 = vld [vmem:[#allocation2 + $0x168] sm:$0xff]  ;;  %v58_v36 = vld [vmem:[#allocation2 + $0x70] sm:$0xff]  ;;  %v55_v38 = vld [vmem:[#allocation2 + $0x58] sm:$0xff] }
  0x19   :  { %154 = vmatpush.msra.mxu2 %v63_v22  ;;  %133 = vmatpush.msra.mxu1 %v96_v25  ;;  %v90_v37 = vld [vmem:[#allocation2 + $0x170] sm:$0xff]  ;;  %v87_v39 = vld [vmem:[#allocation2 + $0x158] sm:$0xff]  ;;  %v56_v40 = vld [vmem:[#allocation2 + $0x60] sm:$0xff] }
  0x1a   :  { %174 = vmatpush.msra.mxu3 %v95_v23  ;;  %114 = vmatpush.msra.mxu0 %v62_v28  ;;  %v88_v41 = vld [vmem:[#allocation2 + $0x160] sm:$0xff]  ;;  %v53_v42 = vld [vmem:[#allocation2 + $0x48] sm:$0xff]  ;;  %v54_v44 = vld [vmem:[#allocation2 + $0x50] sm:$0xff] }
  0x1b   :  { %155 = vmatpush.msra.mxu2 %v61_v26  ;;  %134 = vmatpush.msra.mxu1 %v94_v29  ;;  %v85_v43 = vld [vmem:[#allocation2 + $0x148] sm:$0xff]  ;;  %v86_v45 = vld [vmem:[#allocation2 + $0x150] sm:$0xff]  ;;  %v51_v46 = vld [vmem:[#allocation2 + $0x38] sm:$0xff] }
  0x1c   :  { %175 = vmatpush.msra.mxu3 %v93_v27  ;;  %115 = vmatpush.msra.mxu0 %v60_v32  ;;  %v83_v47 = vld [vmem:[#allocation2 + $0x138] sm:$0xff]  ;;  %v52_v48 = vld [vmem:[#allocation2 + $0x40] sm:$0xff]  ;;  %v49_v50 = vld [vmem:[#allocation2 + $0x28] sm:$0xff] }
  0x1d   :  { %156 = vmatpush.msra.mxu2 %v59_v30  ;;  %135 = vmatpush.msra.mxu1 %v92_v33  ;;  %v84_v49 = vld [vmem:[#allocation2 + $0x140] sm:$0xff]  ;;  %v81_v51 = vld [vmem:[#allocation2 + $0x128] sm:$0xff]  ;;  %v50_v52 = vld [vmem:[#allocation2 + $0x30] sm:$0xff] }
  0x1e   :  { %176 = vmatpush.msra.mxu3 %v91_v31  ;;  %116 = vmatpush.msra.mxu0 %v58_v36  ;;  %v82_v53 = vld [vmem:[#allocation2 + $0x130] sm:$0xff]  ;;  %v47_v54 = vld [vmem:[#allocation2 + $0x18] sm:$0xff]  ;;  %v48_v56 = vld [vmem:[#allocation2 + $0x20] sm:$0xff] }
  0x1f   :  { %157 = vmatpush.msra.mxu2 %v57_v34  ;;  %136 = vmatpush.msra.mxu1 %v90_v37  ;;  %v79_v55 = vld [vmem:[#allocation2 + $0x118] sm:$0xff]  ;;  %v80_v57 = vld [vmem:[#allocation2 + $0x120] sm:$0xff]  ;;  %v45_v58 = vld [vmem:[#allocation2 + $0x8] sm:$0xff] }
  0x20   :  { %177 = vmatpush.msra.mxu3 %v89_v35  ;;  %117 = vmatpush.msra.mxu0 %v56_v40  ;;  %v77_v59 = vld [vmem:[#allocation2 + $0x108] sm:$0xff]  ;;  %v42_v60 = vld [vmem:[#allocation5] sm:$0xff]  ;;  %v46_v62 = vld [vmem:[#allocation2 + $0x10] sm:$0xff] }
  0x21   :  { %158 = vmatpush.msra.mxu2 %v55_v38  ;;  %137 = vmatpush.msra.mxu1 %v88_v41  ;;  %v43_v61 = vld [vmem:[#allocation5 + $0x8] sm:$0xff]  ;;  %v78_v63 = vld [vmem:[#allocation2 + $0x110] sm:$0xff]  ;;  %v44_v0 = vld [vmem:[#allocation2] sm:$0xff] }
  0x22   :  { %178 = vmatpush.msra.mxu3 %v87_v39  ;;  %118 = vmatpush.msra.mxu0 %v54_v44  ;;  %v76_v1 = vld [vmem:[#allocation2 + $0x100] sm:$0xff] }
  0x23   :  { %159 = vmatpush.msra.mxu2 %v53_v42  ;;  %138 = vmatpush.msra.mxu1 %v86_v45 }
  0x24   :  { %179 = vmatpush.msra.mxu3 %v85_v43  ;;  %119 = vmatpush.msra.mxu0 %v52_v48 }
  0x25   :  { %160 = vmatpush.msra.mxu2 %v51_v46  ;;  %139 = vmatpush.msra.mxu1 %v84_v49 }
  0x26   :  { %180 = vmatpush.msra.mxu3 %v83_v47  ;;  %120 = vmatpush.msra.mxu0 %v50_v52 }
  0x27   :  { %161 = vmatpush.msra.mxu2 %v49_v50  ;;  %140 = vmatpush.msra.mxu1 %v82_v53 }
  0x28   :  { %181 = vmatpush.msra.mxu3 %v81_v51  ;;  %121 = vmatpush.msra.mxu0 %v48_v56 }
  0x29   :  { %162 = vmatpush.msra.mxu2 %v47_v54  ;;  %141 = vmatpush.msra.mxu1 %v80_v57 }
  0x2a   :  { %182 = vmatpush.msra.mxu3 %v79_v55  ;;  %122 = vmatpush.msra.mxu0 %v46_v62 }
  0x2b   :  { %163 = vmatpush.msra.mxu2 %v45_v58  ;;  %142 = vmatpush.msra.mxu1 %v78_v63 }
  0x2c   :  { %183 = vmatpush.msra.mxu3 %v77_v59  ;;  %164 = vmatmul.f32.vlgmr.msra.gmra.mxu2 %v42_v60 }
  0x2d   :  { %184 = vmatmul.f32.vlgmr.msra.gmra.mxu3 %v43_v61  ;;  %123 = vmatpush.msra.mxu0 %v44_v0 }
  0x2e   :  { %143 = vmatpush.msra.mxu1 %v76_v1  ;;  %124 = vmatmul.f32.vlgmr.msra.gmra.mxu0 %v42_v60 }
  0x2f   :  { %144 = vmatmul.f32.vlgmr.msra.gmra.mxu1 %v43_v61 }
  0xab   :  { %v125_v2 = vpop.f32.mrf.mxu0 }
  0xac   :  { %v145_v3 = vpop.f32.mrf.mxu1 }
  0xad   :  { %v146_v4 = vadd.f32 %v145_v3, %v125_v2 }
  0xaf   :  { %v165_v5 = vpop.f32.mrf.mxu2  ;;  %188 = vst [vmem:[#allocation7] sm:$0xff] %v146_v4 }
  0xb0   :  { %v185_v6 = vpop.f32.mrf.mxu3 }
  0xb1   :  { %v186_v7 = vadd.f32 %v185_v6, %v165_v5 }
  0xb3   :  { %189 = vst [vmem:[#allocation7 + $0x8] sm:$0xff] %v186_v7 }
  0xb4   :  { %200 = dma.vmem_to_hbm [thread:$0]  %s196_s1, 256, %s198_s23, [#allocation4]  }
  0xb5   :  { %289 = dma.done.wait [#allocation4], 256  }
  0xb6   :  { %290 = vsyncadd [#allocation4], 4294967040 }
  0xb7   :  { %205 = vsyncpa [#allocation3], 1 }
  0xb8   :  { %206 = vsyncpa [#allocation6], 1 }
  0xb9   :  { %207 = vsyncpa [#allocation4], 1 }

</bundles_post_ra>
